<compile_context>
chip_gen: v7x
topology: tpu7x:2x2x1
jax: 0.10.0
libtpu: 0.0.40
codegen_flags: <defaults>
</compile_context>

<pallas_src>
import functools

import jax
import jax.numpy as jnp
from jax.experimental import pallas as pl
from jax.experimental.pallas import tpu as pltpu

NEG_SLOPE = 0.01      # nn.LeakyReLU default
BN_EPS = 1e-5         # nn.BatchNorm1d default
LANES = 128
SUBLANES = 8


def _round_up(n, m):
    return (n + m - 1) // m * m


def _leaky_relu(h):
    # mul + max (2 VALU ops) instead of cmp + mul + select.
    return jnp.maximum(h, NEG_SLOPE * h)


# -----------------------------------------------------------------------------
# Fused kernel (whole network, one grid step = one batch tile)
# -----------------------------------------------------------------------------
def _make_fused_kernel(shared_hidden, indiv_hidden, bias_slices, compute_dtype):
    """Builds kernel(x_ref, bias_ref, *weight_refs, o_ref).

    Weight consumption order (matches _pack_params):
      shared hidden x shared_hidden, shared out, event Wx, event Ws,
      event deeper x max(indiv_hidden-1, 0), event out (absent if indiv_hidden == 0,
      in which case Wx/Ws already ARE the padded output weights).
    bias_slices: list of (row, width) into the packed bias buffer, same order.
    """

    def kernel(x_ref, b_ref, *rest):
        o_ref = rest[-1]
        w_refs = rest[:-1]
        w_it = iter(w_refs)
        b_it = iter(bias_slices)

        def bias():
            r, w = next(b_it)
            return b_ref[r:r + 1, :w]                       # (1, w) f32, static ref slice

        def mm(a, w_ref):                                   # MXU dot, f32 accumulate
            return jnp.dot(a.astype(compute_dtype), w_ref[...],
                           preferred_element_type=jnp.float32)

        x = x_ref[...].astype(jnp.float32)

        # ---- shared MLP (BN already folded into the following Linear) ----
        h = x
        for _ in range(shared_hidden):
            h = _leaky_relu(mm(h, next(w_it)) + bias())
        shared = mm(h, next(w_it)) + bias()

        # ---- all event MLPs fused; concat-free first layer ----
        wx, ws = next(w_it), next(w_it)
        h = mm(x, wx) + mm(shared, ws) + bias()
        if indiv_hidden >= 1:
            h = _leaky_relu(h)
            for _ in range(indiv_hidden - 1):
                h = _leaky_relu(mm(h, next(w_it)) + bias())  # block-diag hidden layer
            h = mm(h, next(w_it)) + bias()                   # block-diag output layer

        o_ref[...] = h.astype(o_ref.dtype)                   # lane-dense, unmasked store

    return kernel


# -----------------------------------------------------------------------------
# Wrapper: fold BN into the next Linear, fuse event nets, pack biases, one pallas_call
# -----------------------------------------------------------------------------
def _bn_fold_params(gamma, beta, mean, var):
    scale = gamma * jax.lax.rsqrt(var + BN_EPS)
    shift = beta - mean * scale
    return scale, shift


def _fold_bn_into_linear(scale, shift, w, b):
    # (a * scale + shift) @ w + b  ==  a @ (scale.T * w) + (shift @ w + b)   [done in f32]
    w2 = scale.reshape(-1, 1) * w
    b2 = jnp.dot(shift, w, precision=jax.lax.Precision.HIGHEST) + b
    return w2, b2


def _block_diag(blocks):
    rows = sum(b.shape[0] for b in blocks)
    cols = sum(b.shape[1] for b in blocks)
    out = jnp.zeros((rows, cols), blocks[0].dtype)
    r = c = 0
    for b in blocks:
        out = out.at[r:r + b.shape[0], c:c + b.shape[1]].set(b)
        r += b.shape[0]
        c += b.shape[1]
    return out


def _pack_params(params, in_features, compute_dtype):
    """Fold BN, fuse event MLPs into wide/block-diag layers, pack biases.

    Returns (weights, bias_packed, bias_slices, out_width, out_width_padded).
    """
    weights, biases = [], []

    # ---- shared MLP ----
    prev_bn = None
    for (w, b, g, be, m, v) in params["shared"]["hidden"]:
        if prev_bn is not None:
            w, b = _fold_bn_into_linear(*prev_bn, w, b)
        weights.append(w)
        biases.append(b)
        prev_bn = _bn_fold_params(g, be, m, v)
    w, b = params["shared"]["out"]
    if prev_bn is not None:
        w, b = _fold_bn_into_linear(*prev_bn, w, b)
    weights.append(w)
    biases.append(b)

    # ---- event MLPs ----
    events = params["events"]
    indiv_hidden = len(events[0]["hidden"])
    out_features = events[0]["out"][0].shape[1]
    num_events = len(events)
    out_width = num_events * out_features
    out_width_padded = _round_up(out_width, LANES)
    pad = out_width_padded - out_width

    if indiv_hidden == 0:
        # Each event net is a single Linear on [x | shared]: split rows, concat events, pad lanes.
        wx = jnp.concatenate([ev["out"][0][:in_features, :] for ev in events], axis=1)
        ws = jnp.concatenate([ev["out"][0][in_features:, :] for ev in events], axis=1)
        bo = jnp.concatenate([ev["out"][1] for ev in events], axis=1)
        weights += [jnp.pad(wx, ((0, 0), (0, pad))), jnp.pad(ws, ((0, 0), (0, pad)))]
        biases.append(jnp.pad(bo, ((0, 0), (0, pad))))
    else:
        # layer 1: [x | shared] @ concat_e(W1_e)   (concat-free: split into Wx / Ws)
        wx = jnp.concatenate([ev["hidden"][0][0][:in_features, :] for ev in events], axis=1)
        ws = jnp.concatenate([ev["hidden"][0][0][in_features:, :] for ev in events], axis=1)
        b1 = jnp.concatenate([ev["hidden"][0][1] for ev in events], axis=1)
        weights += [wx, ws]
        biases.append(b1)
        prev_bns = [_bn_fold_params(*ev["hidden"][0][2:]) for ev in events]

        # deeper hidden layers: block-diagonal, previous BN folded per event
        for l in range(1, indiv_hidden):
            ws_l, bs_l, new_bns = [], [], []
            for e, ev in enumerate(events):
                w, b, g, be, m, v = ev["hidden"][l]
                w, b = _fold_bn_into_linear(*prev_bns[e], w, b)
                ws_l.append(w)
                bs_l.append(b)
                new_bns.append(_bn_fold_params(g, be, m, v))
            weights.append(_block_diag(ws_l))
            biases.append(jnp.concatenate(bs_l, axis=1))
            prev_bns = new_bns

        # output layer: block-diagonal, last BN folded, padded to a multiple of 128 lanes
        ws_o, bs_o = [], []
        for e, ev in enumerate(events):
            w, b = ev["out"]
            w, b = _fold_bn_into_linear(*prev_bns[e], w, b)
            ws_o.append(w)
            bs_o.append(b)
        weights.append(jnp.pad(_block_diag(ws_o), ((0, 0), (0, pad))))
        biases.append(jnp.pad(jnp.concatenate(bs_o, axis=1), ((0, 0), (0, pad))))

    # ---- pack biases (f32) into one 2-D buffer; weights to the MXU compute dtype ----
    bias_w = _round_up(max(b.shape[1] for b in biases), LANES)
    bias_packed = jnp.zeros((len(biases), bias_w), jnp.float32)
    bias_slices = []
    for r, b in enumerate(biases):
        bias_packed = bias_packed.at[r, :b.shape[1]].set(b[0].astype(jnp.float32))
        bias_slices.append((r, int(b.shape[1])))
    weights = [w.astype(compute_dtype) for w in weights]

    return weights, bias_packed, bias_slices, out_width, out_width_padded


def _pick_tile_b(batch):
    # Generation-aware batch tile: v7x has 64 MiB VMEM/TC (256-row tiles), v5e/v6e 128 MiB (512).
    try:
        vmem = pltpu.get_tpu_info().vmem_capacity_bytes
    except Exception:
        vmem = 64 * 1024 * 1024
    tile = 512 if vmem >= 100 * 1024 * 1024 else 256
    return min(tile, _round_up(batch, SUBLANES))


def cause_specific_forward(x, params, compute_dtype=jnp.bfloat16):
    batch, in_features = x.shape
    shared_hidden = len(params["shared"]["hidden"])
    num_events = len(params["events"])
    indiv_hidden = len(params["events"][0]["hidden"])
    out_features = params["events"][0]["out"][0].shape[1]

    weights, bias_packed, bias_slices, out_w, out_w_pad = _pack_params(
        params, in_features, compute_dtype)

    tile_b = _pick_tile_b(batch)
    batch_padded = _round_up(batch, tile_b)
    if batch_padded != batch:
        x = jnp.pad(x, ((0, batch_padded - batch), (0, 0)))
    grid = (batch_padded // tile_b,)

    kernel = _make_fused_kernel(shared_hidden, indiv_hidden, bias_slices, compute_dtype)

    in_specs = (
        [pl.BlockSpec((tile_b, in_features), lambda i: (i, 0))] +       # x: row tiles, pipelined
        [pl.BlockSpec(bias_packed.shape, lambda i: (0, 0))] +           # biases: VMEM-resident
        [pl.BlockSpec(w.shape, lambda i: (0, 0)) for w in weights]      # weights: VMEM-resident
    )
    out_specs = pl.BlockSpec((tile_b, out_w_pad), lambda i: (i, 0))

    out = pl.pallas_call(
        kernel,
        grid=grid,
        in_specs=in_specs,
        out_specs=out_specs,
        out_shape=jax.ShapeDtypeStruct((batch_padded, out_w_pad), x.dtype),
        compiler_params=pltpu.CompilerParams(
            dimension_semantics=("parallel",),
            # Sized to fit v7x's 64 MiB physical VMEM; plenty of headroom on v5e/v6e (128 MiB).
            vmem_limit_bytes=48 * 1024 * 1024,
        ),
    )(x, bias_packed, *weights)

    # Event e lives in lanes [e*out_features, (e+1)*out_features): strip padding, free reshape.
    return out[:batch, :out_w].reshape(batch, num_events, out_features)


# -----------------------------------------------------------------------------
# Deterministic parameter construction (synthetic init, no checkpoint load)
# -----------------------------------------------------------------------------
def _init_linear(key, n_in, n_out):
    kw, kb = jax.random.split(key)
    scale = 1.0 / jnp.sqrt(jnp.float32(n_in))
    w = jax.random.uniform(kw, (n_in, n_out), jnp.float32, -scale, scale)
    b = jax.random.uniform(kb, (1, n_out), jnp.float32, -scale, scale)
    return w, b


def _init_bn(key, n):
    k1, k2, k3, k4 = jax.random.split(key, 4)
    gamma = 1.0 + 0.1 * jax.random.normal(k1, (1, n), jnp.float32)
    beta = 0.1 * jax.random.normal(k2, (1, n), jnp.float32)
    mean = 0.1 * jax.random.normal(k3, (1, n), jnp.float32)
    var = 1.0 + 0.1 * jax.random.uniform(k4, (1, n), jnp.float32)
    return gamma, beta, mean, var


def init_mlp_vanilla(key, in_features, num_nodes, out_features):
    """torchtuples MLPVanilla: [Linear -> LeakyReLU -> BN]*len(num_nodes) then Linear."""
    params = {"hidden": [], "out": None}
    dims = [in_features] + list(num_nodes)
    for i in range(len(num_nodes)):
        key, klin, kbn = jax.random.split(key, 3)
        w, b = _init_linear(klin, dims[i], dims[i + 1])
        gamma, beta, mean, var = _init_bn(kbn, dims[i + 1])
        params["hidden"].append((w, b, gamma, beta, mean, var))
    key, kout = jax.random.split(key)
    params["out"] = _init_linear(kout, dims[-1], out_features)
    return params


def init_cause_specific_net(key, in_features, indiv_intermediate_size,
                            indiv_num_hidden_layers, shared_intermediate_size,
                            shared_num_hidden_layers, out_features, num_events):
    key, ks = jax.random.split(key)
    params = {
        "shared": init_mlp_vanilla(
            ks, in_features,
            [shared_intermediate_size] * shared_num_hidden_layers,
            shared_intermediate_size),
        "events": [],
    }
    for _ in range(num_events):
        key, ke = jax.random.split(key)
        params["events"].append(init_mlp_vanilla(
            ke, in_features + shared_intermediate_size,
            [indiv_intermediate_size] * indiv_num_hidden_layers,
            out_features))
    return params


# -----------------------------------------------------------------------------
# Reference (pure JAX, unfolded BN, per-event MLPs, explicit concat) for checking
# -----------------------------------------------------------------------------
def _ref_mlp(x, params):
    h = x
    for (w, b, gamma, beta, mean, var) in params["hidden"]:
        h = jnp.dot(h, w, precision=jax.lax.Precision.HIGHEST) + b
        h = jnp.where(h >= 0.0, h, NEG_SLOPE * h)
        h = (h - mean) * jax.lax.rsqrt(var + BN_EPS) * gamma + beta
    w, b = params["out"]
    return jnp.dot(h, w, precision=jax.lax.Precision.HIGHEST) + b


def _ref_forward(x, params):
    shared = _ref_mlp(x, params["shared"])
    combined = jnp.concatenate([x, shared], axis=1)
    return jnp.stack([_ref_mlp(combined, ev) for ev in params["events"]], axis=1)


# -----------------------------------------------------------------------------
if __name__ == "__main__":
    batch = 4
    in_features = 16
    shared_intermediate_size = 32
    shared_num_hidden_layers = 2
    indiv_intermediate_size = 32
    indiv_num_hidden_layers = 2
    out_features = 8
    num_events = 2

    key = jax.random.PRNGKey(0)
    kx, kp = jax.random.split(key)
    x = jax.random.normal(kx, (batch, in_features), jnp.float32)

    params = init_cause_specific_net(
        kp, in_features, indiv_intermediate_size, indiv_num_hidden_layers,
        shared_intermediate_size, shared_num_hidden_layers, out_features,
        num_events)

    ref = _ref_forward(x, params)

    # f32 MXU path: validates semantics (BN folding, event fusion, concat-free first layer).
    fwd_f32 = jax.jit(functools.partial(cause_specific_forward, compute_dtype=jnp.float32))
    out_f32 = jax.block_until_ready(fwd_f32(x, params))
    assert out_f32.shape == (batch, num_events, out_features), out_f32.shape
    assert jnp.allclose(out_f32, ref, atol=1e-2, rtol=1e-2), "f32 kernel mismatch vs reference"

    # bf16 MXU path (default): looser tolerance for bf16 weight/activation quantization.
    fwd_bf16 = jax.jit(functools.partial(cause_specific_forward, compute_dtype=jnp.bfloat16))
    out_bf16 = jax.block_until_ready(fwd_bf16(x, params))
    assert out_bf16.shape == (batch, num_events, out_features), out_bf16.shape
    assert jnp.allclose(out_bf16, ref, atol=5e-2, rtol=5e-2), "bf16 kernel mismatch vs reference"

    print("KERNEL_OK")
</pallas_src>

<mosaic_0001>
module attributes {stable_mosaic.version = 11 : i64} {
  func.func @kernel(%arg0: i32, %arg1: memref<8x16xf32, #tpu.memory_space<vmem>>, %arg2: memref<6x128xf32, #tpu.memory_space<vmem>>, %arg3: memref<16x32xf32, #tpu.memory_space<vmem>>, %arg4: memref<32x32xf32, #tpu.memory_space<vmem>>, %arg5: memref<32x32xf32, #tpu.memory_space<vmem>>, %arg6: memref<16x64xf32, #tpu.memory_space<vmem>>, %arg7: memref<32x64xf32, #tpu.memory_space<vmem>>, %arg8: memref<64x64xf32, #tpu.memory_space<vmem>>, %arg9: memref<64x128xf32, #tpu.memory_space<vmem>>, %arg10: memref<8x128xf32, #tpu.memory_space<vmem>>) attributes {dimension_semantics = [#tpu.dimension_semantics<parallel>], iteration_bounds = array<i64: 1>, scalar_prefetch = 0 : i64, scratch_operands = 0 : i64, tpu.core_type = #tpu.core_type<tc>, window_params = [{transform_indices = @transform_0, window_bounds = array<i64: 8, 16>}, {pipeline_mode = #tpu.pipeline_mode<synchronous>, transform_indices = @transform_1, window_bounds = array<i64: 6, 128>}, {pipeline_mode = #tpu.pipeline_mode<synchronous>, transform_indices = @transform_2, window_bounds = array<i64: 16, 32>}, {pipeline_mode = #tpu.pipeline_mode<synchronous>, transform_indices = @transform_3, window_bounds = array<i64: 32, 32>}, {pipeline_mode = #tpu.pipeline_mode<synchronous>, transform_indices = @transform_4, window_bounds = array<i64: 32, 32>}, {pipeline_mode = #tpu.pipeline_mode<synchronous>, transform_indices = @transform_5, window_bounds = array<i64: 16, 64>}, {pipeline_mode = #tpu.pipeline_mode<synchronous>, transform_indices = @transform_6, window_bounds = array<i64: 32, 64>}, {pipeline_mode = #tpu.pipeline_mode<synchronous>, transform_indices = @transform_7, window_bounds = array<i64: 64, 64>}, {pipeline_mode = #tpu.pipeline_mode<synchronous>, transform_indices = @transform_8, window_bounds = array<i64: 64, 128>}, {transform_indices = @transform_9, window_bounds = array<i64: 8, 128>}]} {
    %c0 = arith.constant 0 : index
    %c0_0 = arith.constant 0 : index
    %0 = vector.load %arg1[%c0, %c0_0] : memref<8x16xf32, #tpu.memory_space<vmem>>, vector<8x16xf32>
    %c0_1 = arith.constant 0 : index
    %c0_2 = arith.constant 0 : index
    %1 = vector.load %arg3[%c0_1, %c0_2] : memref<16x32xf32, #tpu.memory_space<vmem>>, vector<16x32xf32>
    %cst = arith.constant dense<0.000000e+00> : vector<8x32xf32>
    %2 = tpu.matmul %0, %1, %cst {dimension_numbers = #tpu.dot_dimension_numbers<[1], [0], [0], [1], [0, 0, 1, 1], [], []>} : vector<8x16xf32>, vector<16x32xf32>, vector<8x32xf32> -> vector<8x32xf32>
    %c0_3 = arith.constant 0 : index
    %c0_4 = arith.constant 0 : index
    %3 = vector.load %arg2[%c0_3, %c0_4] : memref<6x128xf32, #tpu.memory_space<vmem>>, vector<1x32xf32>
    %4 = vector.broadcast %3 : vector<1x32xf32> to vector<8x32xf32>
    %5 = arith.addf %2, %4 : vector<8x32xf32>
    %cst_5 = arith.constant 0.00999999977 : f32
    %6 = vector.broadcast %cst_5 : f32 to vector<8x32xf32>
    %7 = arith.mulf %6, %5 : vector<8x32xf32>
    %8 = arith.maximumf %5, %7 : vector<8x32xf32>
    %c0_6 = arith.constant 0 : index
    %c0_7 = arith.constant 0 : index
    %9 = vector.load %arg4[%c0_6, %c0_7] : memref<32x32xf32, #tpu.memory_space<vmem>>, vector<32x32xf32>
    %cst_8 = arith.constant dense<0.000000e+00> : vector<8x32xf32>
    %10 = tpu.matmul %8, %9, %cst_8 {dimension_numbers = #tpu.dot_dimension_numbers<[1], [0], [0], [1], [0, 0, 1, 1], [], []>} : vector<8x32xf32>, vector<32x32xf32>, vector<8x32xf32> -> vector<8x32xf32>
    %c1 = arith.constant 1 : index
    %c0_9 = arith.constant 0 : index
    %11 = vector.load %arg2[%c1, %c0_9] : memref<6x128xf32, #tpu.memory_space<vmem>>, vector<1x32xf32>
    %12 = vector.broadcast %11 : vector<1x32xf32> to vector<8x32xf32>
    %13 = arith.addf %10, %12 : vector<8x32xf32>
    %cst_10 = arith.constant 0.00999999977 : f32
    %14 = vector.broadcast %cst_10 : f32 to vector<8x32xf32>
    %15 = arith.mulf %14, %13 : vector<8x32xf32>
    %16 = arith.maximumf %13, %15 : vector<8x32xf32>
    %c0_11 = arith.constant 0 : index
    %c0_12 = arith.constant 0 : index
    %17 = vector.load %arg5[%c0_11, %c0_12] : memref<32x32xf32, #tpu.memory_space<vmem>>, vector<32x32xf32>
    %cst_13 = arith.constant dense<0.000000e+00> : vector<8x32xf32>
    %18 = tpu.matmul %16, %17, %cst_13 {dimension_numbers = #tpu.dot_dimension_numbers<[1], [0], [0], [1], [0, 0, 1, 1], [], []>} : vector<8x32xf32>, vector<32x32xf32>, vector<8x32xf32> -> vector<8x32xf32>
    %c2 = arith.constant 2 : index
    %c0_14 = arith.constant 0 : index
    %19 = vector.load %arg2[%c2, %c0_14] : memref<6x128xf32, #tpu.memory_space<vmem>>, vector<1x32xf32>
    %20 = vector.broadcast %19 : vector<1x32xf32> to vector<8x32xf32>
    %21 = arith.addf %18, %20 : vector<8x32xf32>
    %c0_15 = arith.constant 0 : index
    %c0_16 = arith.constant 0 : index
    %22 = vector.load %arg6[%c0_15, %c0_16] : memref<16x64xf32, #tpu.memory_space<vmem>>, vector<16x64xf32>
    %cst_17 = arith.constant dense<0.000000e+00> : vector<8x64xf32>
    %23 = tpu.matmul %0, %22, %cst_17 {dimension_numbers = #tpu.dot_dimension_numbers<[1], [0], [0], [1], [0, 0, 1, 1], [], []>} : vector<8x16xf32>, vector<16x64xf32>, vector<8x64xf32> -> vector<8x64xf32>
    %c0_18 = arith.constant 0 : index
    %c0_19 = arith.constant 0 : index
    %24 = vector.load %arg7[%c0_18, %c0_19] : memref<32x64xf32, #tpu.memory_space<vmem>>, vector<32x64xf32>
    %cst_20 = arith.constant dense<0.000000e+00> : vector<8x64xf32>
    %25 = tpu.matmul %21, %24, %cst_20 {dimension_numbers = #tpu.dot_dimension_numbers<[1], [0], [0], [1], [0, 0, 1, 1], [], []>} : vector<8x32xf32>, vector<32x64xf32>, vector<8x64xf32> -> vector<8x64xf32>
    %26 = arith.addf %23, %25 : vector<8x64xf32>
    %c3 = arith.constant 3 : index
    %c0_21 = arith.constant 0 : index
    %27 = vector.load %arg2[%c3, %c0_21] : memref<6x128xf32, #tpu.memory_space<vmem>>, vector<1x64xf32>
    %28 = vector.broadcast %27 : vector<1x64xf32> to vector<8x64xf32>
    %29 = arith.addf %26, %28 : vector<8x64xf32>
    %cst_22 = arith.constant 0.00999999977 : f32
    %30 = vector.broadcast %cst_22 : f32 to vector<8x64xf32>
    %31 = arith.mulf %30, %29 : vector<8x64xf32>
    %32 = arith.maximumf %29, %31 : vector<8x64xf32>
    %c0_23 = arith.constant 0 : index
    %c0_24 = arith.constant 0 : index
    %33 = vector.load %arg8[%c0_23, %c0_24] : memref<64x64xf32, #tpu.memory_space<vmem>>, vector<64x64xf32>
    %cst_25 = arith.constant dense<0.000000e+00> : vector<8x64xf32>
    %34 = tpu.matmul %32, %33, %cst_25 {dimension_numbers = #tpu.dot_dimension_numbers<[1], [0], [0], [1], [0, 0, 1, 1], [], []>} : vector<8x64xf32>, vector<64x64xf32>, vector<8x64xf32> -> vector<8x64xf32>
    %c4 = arith.constant 4 : index
    %c0_26 = arith.constant 0 : index
    %35 = vector.load %arg2[%c4, %c0_26] : memref<6x128xf32, #tpu.memory_space<vmem>>, vector<1x64xf32>
    %36 = vector.broadcast %35 : vector<1x64xf32> to vector<8x64xf32>
    %37 = arith.addf %34, %36 : vector<8x64xf32>
    %cst_27 = arith.constant 0.00999999977 : f32
    %38 = vector.broadcast %cst_27 : f32 to vector<8x64xf32>
    %39 = arith.mulf %38, %37 : vector<8x64xf32>
    %40 = arith.maximumf %37, %39 : vector<8x64xf32>
    %c0_28 = arith.constant 0 : index
    %c0_29 = arith.constant 0 : index
    %41 = vector.load %arg9[%c0_28, %c0_29] : memref<64x128xf32, #tpu.memory_space<vmem>>, vector<64x128xf32>
    %cst_30 = arith.constant dense<0.000000e+00> : vector<8x128xf32>
    %42 = tpu.matmul %40, %41, %cst_30 {dimension_numbers = #tpu.dot_dimension_numbers<[1], [0], [0], [1], [0, 0, 1, 1], [], []>} : vector<8x64xf32>, vector<64x128xf32>, vector<8x128xf32> -> vector<8x128xf32>
    %c5 = arith.constant 5 : index
    %c0_31 = arith.constant 0 : index
    %43 = vector.load %arg2[%c5, %c0_31] : memref<6x128xf32, #tpu.memory_space<vmem>>, vector<1x128xf32>
    %44 = vector.broadcast %43 : vector<1x128xf32> to vector<8x128xf32>
    %45 = arith.addf %42, %44 : vector<8x128xf32>
    %c0_32 = arith.constant 0 : index
    %c0_33 = arith.constant 0 : index
    %46 = vector.load %arg10[%c0_32, %c0_33] : memref<8x128xf32, #tpu.memory_space<vmem>>, vector<8x128xf32>
    tpu.vector_store %arg10[%c0_32, %c0_33], %45 {strides = array<i32>} : memref<8x128xf32, #tpu.memory_space<vmem>>, vector<8x128xf32>,
    return
  }
  func.func @transform_0(%arg0: i32) -> (i32, i32) {
    %c0_i32 = arith.constant 0 : i32
    %c0_i32_0 = arith.constant 0 : i32
    return %arg0, %c0_i32 : i32, i32
  }
  func.func @transform_1(%arg0: i32) -> (i32, i32) {
    %c0_i32 = arith.constant 0 : i32
    %c0_i32_0 = arith.constant 0 : i32
    %c0_i32_1 = arith.constant 0 : i32
    return %c0_i32, %c0_i32_0 : i32, i32
  }
  func.func @transform_2(%arg0: i32) -> (i32, i32) {
    %c0_i32 = arith.constant 0 : i32
    %c0_i32_0 = arith.constant 0 : i32
    %c0_i32_1 = arith.constant 0 : i32
    return %c0_i32, %c0_i32_0 : i32, i32
  }
  func.func @transform_3(%arg0: i32) -> (i32, i32) {
    %c0_i32 = arith.constant 0 : i32
    %c0_i32_0 = arith.constant 0 : i32
    %c0_i32_1 = arith.constant 0 : i32
    return %c0_i32, %c0_i32_0 : i32, i32
  }
  func.func @transform_4(%arg0: i32) -> (i32, i32) {
    %c0_i32 = arith.constant 0 : i32
    %c0_i32_0 = arith.constant 0 : i32
    %c0_i32_1 = arith.constant 0 : i32
    return %c0_i32, %c0_i32_0 : i32, i32
  }
  func.func @transform_5(%arg0: i32) -> (i32, i32) {
    %c0_i32 = arith.constant 0 : i32
    %c0_i32_0 = arith.constant 0 : i32
    %c0_i32_1 = arith.constant 0 : i32
    return %c0_i32, %c0_i32_0 : i32, i32
  }
  func.func @transform_6(%arg0: i32) -> (i32, i32) {
    %c0_i32 = arith.constant 0 : i32
    %c0_i32_0 = arith.constant 0 : i32
    %c0_i32_1 = arith.constant 0 : i32
    return %c0_i32, %c0_i32_0 : i32, i32
  }
  func.func @transform_7(%arg0: i32) -> (i32, i32) {
    %c0_i32 = arith.constant 0 : i32
    %c0_i32_0 = arith.constant 0 : i32
    %c0_i32_1 = arith.constant 0 : i32
    return %c0_i32, %c0_i32_0 : i32, i32
  }
  func.func @transform_8(%arg0: i32) -> (i32, i32) {
    %c0_i32 = arith.constant 0 : i32
    %c0_i32_0 = arith.constant 0 : i32
    %c0_i32_1 = arith.constant 0 : i32
    return %c0_i32, %c0_i32_0 : i32, i32
  }
  func.func @transform_9(%arg0: i32) -> (i32, i32) {
    %c0_i32 = arith.constant 0 : i32
    %c0_i32_0 = arith.constant 0 : i32
    return %arg0, %c0_i32 : i32, i32
  }
}

</mosaic_0001>

<bundles_post_ra>
// kernel: cause_specific_forward.1
= control target key start
LH: loop header
LB: loop body
LE: loop exit
PB: predicated region body
PF: predicated region fallthrough
CT: control target
= control target key end

     0   :  { %v808_v0 = vmov 0.0|0.0   ;;  %vm809_vm0 = vmmov 0   ;;  %v810_v3 = vmov 0.0   ;;  %vm40_vm1 = vcmask 130048   ;;  %s1018_s2 = inlined_call_operand.vmem [shape: f32[16,32], index: 2, kind: input, shape index: {}]   ;;  %s1019_s0 = inlined_call_operand.vmem [shape: f32[8,16], index: 0, kind: input, shape index: {}]   ;;  %s1020_s3 = inlined_call_operand.vmem [shape: f32[32,32], index: 3, kind: input, shape index: {}]   ;;  %s1021_s1 = inlined_call_operand.vmem [shape: f32[6,128], index: 1, kind: input, shape index: {}]   ;;  %s1022_s4 = inlined_call_operand.vmem [shape: f32[32,32], index: 4, kind: input, shape index: {}]   ;;  %s1023_s6 = inlined_call_operand.vmem [shape: f32[32,64], index: 6, kind: input, shape index: {}]   ;;  %s1024_s5 = inlined_call_operand.vmem [shape: f32[16,64], index: 5, kind: input, shape index: {}]   ;;  %s1025_s7 = inlined_call_operand.vmem [shape: f32[64,64], index: 7, kind: input, shape index: {}]   ;;  %s1026_s8 = inlined_call_operand.vmem [shape: f32[64,128], index: 8, kind: input, shape index: {}]   ;;  %s1027_s9 = inlined_call_operand.vmem [shape: f32[8,128], index: 9, kind: output, shape index: {}]  }
   0x1   :  { %757 = vmatprep.subr.bf16.mxu0 %v808_v0  ;;  %v33_v1 = vld [vmem:[%s1018_s2] sm:$0xff]  ;;  %v34_v2 = vld [vmem:[%s1018_s2 + $0x8] sm:$0xff]  ;;  %676 = vmatprep.mubr.msk.f32.mxu0 %vm809_vm0, %v810_v3  ;;  %v118_v9 = vld [vmem:[%s1020_s3 + $0x10] sm:$0xff]  ;;  %vm125_vm2 = vcmask 261120   ;;  %vm453_vm3 = vcmask 523264  }
   0x2   :  { %v758_v4 = vpack.c.bf16 %v34_v2, %v33_v1  ;;  %760 = vmatprep.subr.bf16.mxu1 %v808_v0  ;;  %687 = vmatprep.mubr.msk.f32.mxu1 %vm809_vm0, %v810_v3  ;;  %v32_v5 = vld [vmem:[%s1019_s0] sm:$0xff]  ;;  %v117_v7 = vld [vmem:[%s1020_s3 + $0x8] sm:$0xff]  ;;  %v119_v10 = vld [vmem:[%s1020_s3 + $0x18] sm:$0xff] }
   0x3   :  { %v116_v6 = vld [vmem:[%s1020_s3] sm:$0xff]  ;;  %v764_v11 = vpack.c.bf16 %v119_v10, %v118_v9  ;;  %v202_v19 = vld [vmem:[%s1022_s4 + $0x8] sm:$0xff]  ;;  %v203_v21 = vld [vmem:[%s1022_s4 + $0x10] sm:$0xff] }
   0x4   :  { %759 = vmatpush3.bf16.msra.mxu0 %v758_v4  ;;  %v761_v8 = vpack.c.bf16 %v117_v7, %v116_v6  ;;  %v620_v12 = vld [vmem:[%s1021_s1] ss:$0 sm:$0xff]  ;;  %v204_v22 = vld [vmem:[%s1022_s4 + $0x18] sm:$0xff]  ;;  %v286_v25 = vld [vmem:[%s1023_s6 + $0x8] sm:$0xff] }
   0x5   :  { %766 = vmatprep.subr.bf16.mxu0 %v808_v0  ;;  %v201_v18 = vld [vmem:[%s1022_s4] sm:$0xff]  ;;  %v770_v23 = vpack.c.bf16 %v204_v22, %v203_v21  ;;  %v284_v32 = vld [vmem:[%s1024_s5 + $0x8] sm:$0xff]  ;;  %v287_v36 = vld [vmem:[%s1023_s6 + $0x10] sm:$0xff] }
   0x6   :  { %762 = vmatpush3.bf16.msra.mxu1 %v761_v8  ;;  %v767_v20 = vpack.c.bf16 %v202_v19, %v201_v18  ;;  %v285_v24 = vld [vmem:[%s1023_s6] sm:$0xff]  ;;  %v288_v37 = vld [vmem:[%s1023_s6 + $0x18] sm:$0xff]  ;;  %v441_v40 = vld [vmem:[%s1025_s7 + $0x8] sm:$0xff] }
   0x7   :  { %677 = vmatmul.mubr.msk.f32.vlgmr.msra.gmra.mrb[0].mxu0 %vm40_vm1, %v32_v5  ;;  %763 = vmatprep.subr.bf16.mxu1 %v808_v0  ;;  %v773_v26 = vpack.c.bf16 %v286_v25, %v285_v24  ;;  %v622_v27 = vld [vmem:[%s1021_s1 + $0x1] ss:$0 sm:$0xff]  ;;  %v776_v38 = vpack.c.bf16 %v288_v37, %v287_v36  ;;  %v442_v41 = vld [vmem:[%s1025_s7 + $0x10] sm:$0xff]  ;;  %v443_v43 = vld [vmem:[%s1025_s7 + $0x18] sm:$0xff] }
   0x8   :  { %698 = vmatprep.mubr.msk.f32.mxu0 %vm809_vm0, %v810_v3  ;;  %768 = vmatpush3.bf16.msra.mxu0 %v767_v20  ;;  %v283_v31 = vld [vmem:[%s1024_s5] sm:$0xff]  ;;  %v785_v44 = vpack.c.bf16 %v443_v43, %v442_v41  ;;  %v445_v52 = vld [vmem:[%s1025_s7 + $0x28] sm:$0xff]  ;;  %v446_v54 = vld [vmem:[%s1025_s7 + $0x30] sm:$0xff] }
   0x9   :  { %769 = vmatprep.subr.bf16.mxu0 %v808_v0  ;;  %v779_v34 = vpack.c.bf16 %v284_v32, %v283_v31  ;;  %v440_v39 = vld [vmem:[%s1025_s7] sm:$0xff]  ;;  %v447_v55 = vld [vmem:[%s1025_s7 + $0x38] sm:$0xff]  ;;  %v530_v58 = vld [vmem:[%s1026_s8 + $0x8] sm:$0xff] }
   0xa   :  { %765 = vmatpush3.bf16.msra.mxu1 %v764_v11  ;;  %v782_v42 = vpack.c.bf16 %v441_v40, %v440_v39  ;;  %v624_v45 = vld [vmem:[%s1021_s1 + $0x2] ss:$0 sm:$0xff]  ;;  %v791_v56 = vpack.c.bf16 %v447_v55, %v446_v54  ;;  %v531_v59 = vld [vmem:[%s1026_s8 + $0x10] sm:$0xff]  ;;  %v532_v61 = vld [vmem:[%s1026_s8 + $0x18] sm:$0xff] }
   0xb   :  { %772 = vmatprep.subr.bf16.mxu1 %v808_v0  ;;  %v444_v51 = vld [vmem:[%s1025_s7 + $0x20] sm:$0xff]  ;;  %v797_v62 = vpack.c.bf16 %v532_v61, %v531_v59  ;;  %v534_v8 = vld [vmem:[%s1026_s8 + $0x28] sm:$0xff]  ;;  %v535_v10 = vld [vmem:[%s1026_s8 + $0x30] sm:$0xff] }
   0xc   :  { %771 = vmatpush3.bf16.msra.mxu0 %v770_v23  ;;  %v788_v53 = vpack.c.bf16 %v445_v52, %v444_v51  ;;  %v529_v57 = vld [vmem:[%s1026_s8] sm:$0xff]  ;;  %v536_v11 = vld [vmem:[%s1026_s8 + $0x38] sm:$0xff] }
   0xd   :  { %778 = vmatprep.subr.bf16.mxu0 %v808_v0  ;;  %v794_v60 = vpack.c.bf16 %v530_v58, %v529_v57  ;;  %v628_v1 = vld [vmem:[%s1021_s1 + $0x3] ss:$0 sm:$0xff] }
   0xe   :  { %v533_v7 = vld [vmem:[%s1026_s8 + $0x20] sm:$0xff] }
   0xf   :  { %v800_v9 = vpack.c.bf16 %v534_v8, %v533_v7 }
  0xda   :  { %v110_v13 = vpop.f32.mrb[0].mxu0 }
  0xdb   :  { %v111_v14 = vadd.f32 %v620_v12, %v110_v13  ;;  %v678_v15 = vpop.f32.mrb[1].mxu0  ;;  %v803_v12 = vpack.c.bf16 %v536_v11, %v535_v10  ;;  %v629_v13 = vld [vmem:[%s1021_s1 + $0x4] ss:$0 sm:$0xff] }
  0xdd   :  { %v114_v16 = vmul.f32 0.01, %v111_v14 }
  0xdf   :  { %v115_v17 = vmax.f32 %v111_v14, %v114_v16 }
  0xe1   :  { %688 = vmatmul.mubr.msk.f32.vlgmr.msra.gmra.mrb[0].mxu1 %vm125_vm2, %v115_v17 }
  0xe2   :  { %709 = vmatprep.mubr.msk.f32.mxu1 %vm809_vm0, %v810_v3  ;;  %774 = vmatpush3.bf16.msra.mxu1 %v773_v26 }
  0xe3   :  { %775 = vmatprep.subr.bf16.mxu1 %v808_v0 }
  0xe6   :  { %777 = vmatpush3.bf16.msra.mxu1 %v776_v38 }
  0xe7   :  { %793 = vmatprep.subr.bf16.mxu1 %v808_v0 }
 0x1b4   :  { %v195_v28 = vpop.f32.mrb[0].mxu1 }
 0x1b5   :  { %v196_v29 = vadd.f32 %v622_v27, %v195_v28  ;;  %v689_v30 = vpop.f32.mrb[1].mxu1 }
 0x1b7   :  { %v199_v33 = vmul.f32 0.01, %v196_v29 }
 0x1b9   :  { %v200_v35 = vmax.f32 %v196_v29, %v199_v33 }
 0x1bb   :  { %699 = vmatmul.mubr.msk.f32.vlgmr.msra.gmra.mrb[2].mxu0 %vm125_vm2, %v200_v35 }
 0x1bc   :  { %780 = vmatpush3.bf16.msra.mxu0 %v779_v34  ;;  %716 = vmatprep.mubr.msk.f32.mxu0 %vm809_vm0, %v810_v3 }
 0x1bd   :  { %781 = vmatprep.subr.bf16.mxu0 %v808_v0 }
 0x1bf   :  { %717 = vmatmul.mubr.msk.f32.vlgmr.msra.gmra.mrb[4].mxu0 %vm40_vm1, %v32_v5 }
 0x1c0   :  { %735 = vmatprep.mubr.msk.f32.mxu0 %vm809_vm0, %v810_v3  ;;  %783 = vmatpush3.bf16.msra.mxu0 %v782_v42 }
 0x1c1   :  { %784 = vmatprep.subr.bf16.mxu0 %v808_v0 }
 0x1c4   :  { %786 = vmatpush3.bf16.msra.mxu0 %v785_v44 }
 0x1c5   :  { %787 = vmatprep.subr.bf16.mxu0 %v808_v0 }
 0x1c8   :  { %789 = vmatpush3.bf16.msra.mxu0 %v788_v53 }
 0x1c9   :  { %790 = vmatprep.subr.bf16.mxu0 %v808_v0 }
 0x1cc   :  { %792 = vmatpush3.bf16.msra.mxu0 %v791_v56 }
 0x28e   :  { %v279_v46 = vpop.f32.mrb[2].mxu0 }
 0x28f   :  { %v280_v47 = vadd.f32 %v624_v45, %v279_v46  ;;  %v700_v48 = vpop.f32.mrb[3].mxu0 }
 0x291   :  { %710 = vmatmul.mubr.msk.f32.vlgmr.msra.gmra.mrb[2].mxu1 %vm125_vm2, %v280_v47 }
 0x292   :  { %v428_v49 = vpop.f32.mrb[4].mxu0  ;;  %754 = vmatprep.mubr.msk.f32.mxu1 %vm809_vm0, %v810_v3  ;;  %795 = vmatpush3.bf16.msra.mxu1 %v794_v60 }
 0x293   :  { %v718_v50 = vpop.f32.mrb[5].mxu0  ;;  %796 = vmatprep.subr.bf16.mxu1 %v808_v0 }
 0x296   :  { %798 = vmatpush3.bf16.msra.mxu1 %v797_v62 }
 0x297   :  { %799 = vmatprep.subr.bf16.mxu1 %v808_v0 }
 0x29a   :  { %801 = vmatpush3.bf16.msra.mxu1 %v800_v9 }
 0x29b   :  { %802 = vmatprep.subr.bf16.mxu1 %v808_v0  ;;  %v631_v0 = vld [vmem:[%s1021_s1 + $0x5] ss:$0 sm:$0xff] }
 0x29e   :  { %804 = vmatpush3.bf16.msra.mxu1 %v803_v12 }
 0x364   :  { %v358_v63 = vpop.f32.mrb[2].mxu1 }
 0x365   :  { %v429_v2 = vadd.f32 %v428_v49, %v358_v63  ;;  %v711_v3 = vpop.f32.mrb[3].mxu1 }
 0x367   :  { %v437_v4 = vadd.f32 %v628_v1, %v429_v2 }
 0x369   :  { %v438_v5 = vmul.f32 0.01, %v437_v4 }
 0x36b   :  { %v439_v6 = vmax.f32 %v437_v4, %v438_v5 }
 0x36d   :  { %736 = vmatmul.mubr.msk.f32.vlgmr.msra.gmra.mrb[6].mxu0 %vm453_vm3, %v439_v6 }
 0x440   :  { %v523_v14 = vpop.f32.mrb[6].mxu0 }
 0x441   :  { %v524_v15 = vadd.f32 %v629_v13, %v523_v14  ;;  %v737_v16 = vpop.f32.mrb[7].mxu0 }
 0x443   :  { %v527_v17 = vmul.f32 0.01, %v524_v15 }
 0x445   :  { %v528_v18 = vmax.f32 %v524_v15, %v527_v17 }
 0x447   :  { %755 = vmatmul.mubr.msk.f32.vlgmr.msra.gmra.mrb[4].mxu1 %vm453_vm3, %v528_v18 }
 0x51a   :  { %v611_v19 = vpop.f32.mrb[4].mxu1 }
 0x51b   :  { %v612_v20 = vadd.f32 %v631_v0, %v611_v19  ;;  %v756_v21 = vpop.f32.mrb[5].mxu1 }
 0x51d   :  { %615 = vst [vmem:[%s1027_s9] sm:$0xff] %v612_v20 }

</bundles_post_ra>
